<compile_context>
chip_gen: v5e
topology: v5e:2x2
jax: 0.10.0
libtpu: 0.0.40
codegen_flags: <defaults>
</compile_context>

<pallas_src>
import functools

import jax
import jax.numpy as jnp
from jax.experimental import pallas as pl
from jax.experimental.pallas import tpu as pltpu

BN_EPS = 1e-5
VMEM_LIMIT = 32 * 1024 * 1024  # stay <= 32 MB scoped (v7x has 64 MiB physical)


def _stats_kernel(x_ref, stats_ref, *, cin):
    """Pass 1: accumulate sum(x_i) and Gram sum(x_i*x_j) (i<=j), lane-wise.

    x_ref:     (cin, tsub, lanes) block, spatial dense in sublanes+lanes.
    stats_ref: (n_stats, lanes) resident accumulator for this batch chunk.
    """

    @pl.when(pl.program_id(1) == 0)
    def _():
        stats_ref[...] = jnp.zeros_like(stats_ref)

    xs = [x_ref[ci].astype(jnp.float32) for ci in range(cin)]  # (tsub, lanes) slabs

    idx = 0
    for i in range(cin):                                  # per-channel sums
        stats_ref[idx] = stats_ref[idx] + jnp.sum(xs[i], axis=0)
        idx += 1
    for i in range(cin):                                  # Gram (upper triangle)
        for j in range(i, cin):
            stats_ref[idx] = stats_ref[idx] + jnp.sum(xs[i] * xs[j], axis=0)
            idx += 1


def _apply_kernel(w_ref, shift_ref, x_ref, o_ref, *, cin, cout):
    """Pass 2: out_co = relu(sum_ci w[co,ci]*x_ci + shift[co]) on dense slabs."""
    xs = [x_ref[ci].astype(jnp.float32) for ci in range(cin)]  # (tsub, lanes)
    for co in range(cout):
        acc = xs[0] * w_ref[co, 0]
        for ci in range(1, cin):
            acc = acc + xs[ci] * w_ref[co, ci]
        o_ref[co] = jnp.maximum(acc + shift_ref[co], 0.0).astype(o_ref.dtype)


def _pick_sublane_tile(r, cin, cout, lanes, budget_bytes=8 * 1024 * 1024):
    """Largest multiple-of-8 sublane-row tile dividing r within a VMEM budget."""
    if r % 8 != 0:
        return r
    per_row = 2 * (cin + cout) * lanes * 4  # double-buffered f32 in + out rows
    for cand in (512, 256, 128, 64, 32, 16, 8):
        if r % cand == 0 and cand * per_row <= budget_bytes:
            return cand
    return 8


def decoder_forward(x_nchw, conv_w, conv_b, bn_gamma, bn_beta, out_dtype=None):
    """Conv2d(1x1) -> BatchNorm2d (training-mode batch stats) -> ReLU.

    x_nchw: (N, Cin, H, W); conv_w: (Cout, Cin, 1, 1); conv_b/bn_*: (Cout,).
    conv_b is accepted for API parity but has no effect on the output:
    training-mode BatchNorm subtracts the batch mean, cancelling the bias
    exactly (matches the torch module's forward()).
    out_dtype lets v5e users emit bf16 to halve store traffic; defaults to
    the input dtype (module-faithful).
    """
    n, cin, h, w = x_nchw.shape
    cout = conv_w.shape[0]
    s = h * w
    out_dtype = x_nchw.dtype if out_dtype is None else out_dtype

    # Spatial axis dense in sublanes AND lanes (free, contiguous reshape).
    if s % 128 == 0:
        lanes, r = 128, s // 128
    else:
        lanes, r = s, 1  # fallback: full-extent last dim (masked stores if s%128!=0)
    tsub = _pick_sublane_tile(r, cin, cout, lanes)
    grid = (n, r // tsub)

    x4 = x_nchw.reshape(n, cin, r, lanes)
    x_spec = pl.BlockSpec((None, cin, tsub, lanes), lambda ni, si: (ni, 0, si, 0))
    smem_spec = pl.BlockSpec(memory_space=pltpu.MemorySpace.SMEM)

    n_stats = cin + cin * (cin + 1) // 2  # per-channel sums + Gram upper triangle

    # ---- Pass 1: lane-wise sum(x) and Gram(x) partials, per batch chunk ----
    stats = pl.pallas_call(
        functools.partial(_stats_kernel, cin=cin),
        out_shape=jax.ShapeDtypeStruct((n, n_stats, lanes), jnp.float32),
        grid=grid,
        in_specs=[x_spec],
        out_specs=pl.BlockSpec((None, n_stats, lanes), lambda ni, si: (ni, 0, 0)),
        compiler_params=pltpu.CompilerParams(
            dimension_semantics=("parallel", "arbitrary"),
            vmem_limit_bytes=VMEM_LIMIT),
    )(x4)

    # ---- Finalize BN stats from sum/Gram of x (tiny plain-JAX work) --------
    # TODO(synk): for inputs with |mean| >> std over very large N*H*W, switch
    # to a shifted / Welford-style accumulation to avoid f32 cancellation.
    stats_sum = jnp.sum(stats, axis=(0, 2))           # (n_stats,)
    m_total = float(n * s)
    mu_x = stats_sum[:cin] / m_total                  # E[x]         (cin,)
    gram = [[None] * cin for _ in range(cin)]
    idx = cin
    for i in range(cin):
        for j in range(i, cin):
            gram[i][j] = stats_sum[idx]
            gram[j][i] = stats_sum[idx]
            idx += 1
    G = jnp.stack([jnp.stack(row) for row in gram]) / m_total  # E[x x^T] (cin,cin)

    w_mat = conv_w.reshape(cout, cin).astype(jnp.float32)
    mean_y = w_mat @ mu_x                             # batch mean of Wx (bias cancels)
    ey2 = jnp.einsum("oc,cd,od->o", w_mat, G, w_mat)  # E[(Wx)^2] per out channel
    var = jnp.maximum(ey2 - mean_y * mean_y, 0.0)     # biased var, clamped
    scale = bn_gamma.astype(jnp.float32) * jax.lax.rsqrt(var + BN_EPS)
    shift = bn_beta.astype(jnp.float32) - mean_y * scale
    w_scaled = w_mat * scale[:, None]                 # fold gamma/rsqrt into weights

    # ---- Pass 2: out = relu((W*scale) @ x + shift) --------------------------
    out4 = pl.pallas_call(
        functools.partial(_apply_kernel, cin=cin, cout=cout),
        out_shape=jax.ShapeDtypeStruct((n, cout, r, lanes), out_dtype),
        grid=grid,
        in_specs=[smem_spec, smem_spec, x_spec],
        out_specs=pl.BlockSpec((None, cout, tsub, lanes),
                               lambda ni, si: (ni, 0, si, 0)),
        compiler_params=pltpu.CompilerParams(
            dimension_semantics=("parallel", "parallel"),
            vmem_limit_bytes=VMEM_LIMIT),
    )(w_scaled, shift, x4)

    return out4.reshape(n, cout, h, w)


def _reference(x_nchw, conv_w, conv_b, bn_gamma, bn_beta):
    """Pure-JAX reference mirroring torch Conv2d(1x1)+BatchNorm2d(train)+ReLU."""
    y = jnp.einsum("nchw,oc->nohw", x_nchw, conv_w.reshape(conv_w.shape[0], -1))
    y = y + conv_b[None, :, None, None]
    mean = jnp.mean(y, axis=(0, 2, 3), keepdims=True)
    var = jnp.mean((y - mean) ** 2, axis=(0, 2, 3), keepdims=True)
    y = (y - mean) * jax.lax.rsqrt(var + BN_EPS)
    y = y * bn_gamma[None, :, None, None] + bn_beta[None, :, None, None]
    return jnp.maximum(y, 0.0)


if __name__ == "__main__":
    key = jax.random.PRNGKey(0)
    k_x, k_w, k_b = jax.random.split(key, 3)

    N, C_IN, H, W = 2, 4, 16, 16
    C_OUT = 8

    x = jax.random.normal(k_x, (N, C_IN, H, W), dtype=jnp.float32)

    # Deterministic parameter init (shapes from nn.Conv2d / nn.BatchNorm2d).
    bound = 1.0 / jnp.sqrt(C_IN)
    conv_w = jax.random.uniform(k_w, (C_OUT, C_IN, 1, 1), jnp.float32, -bound, bound)
    conv_b = jax.random.uniform(k_b, (C_OUT,), jnp.float32, -bound, bound)
    bn_gamma = jnp.ones((C_OUT,), jnp.float32)   # fresh BatchNorm2d: weight=1
    bn_beta = jnp.zeros((C_OUT,), jnp.float32)   # fresh BatchNorm2d: bias=0

    decoder_jit = jax.jit(decoder_forward)
    out = jax.block_until_ready(decoder_jit(x, conv_w, conv_b, bn_gamma, bn_beta))
    ref = jax.block_until_ready(_reference(x, conv_w, conv_b, bn_gamma, bn_beta))

    assert out.shape == (N, C_OUT, H, W)
    assert jnp.max(jnp.abs(out - ref)) < 1e-4
    print("KERNEL_OK")
</pallas_src>

<mosaic_0001>
module attributes {stable_mosaic.version = 11 : i64} {
  func.func @_stats_kernel(%arg0: i32, %arg1: i32, %arg2: memref<1x4x2x128xf32, #tpu.memory_space<vmem>>, %arg3: memref<1x14x128xf32, #tpu.memory_space<vmem>>) attributes {dimension_semantics = [#tpu.dimension_semantics<parallel>, #tpu.dimension_semantics<arbitrary>], iteration_bounds = array<i64: 2, 1>, scalar_prefetch = 0 : i64, scratch_operands = 0 : i64, tpu.core_type = #tpu.core_type<tc>, window_params = [{transform_indices = @transform_0, window_bounds = array<i64: 1, 4, 2, 128>}, {transform_indices = @transform_1, window_bounds = array<i64: 1, 14, 128>}]} {
    %c0_i32 = arith.constant 0 : i32
    %0 = arith.cmpi eq, %arg1, %c0_i32 : i32
    %1 = arith.extui %0 : i1 to i32
    %c0_i32_0 = arith.constant 0 : i32
    %2 = arith.cmpi ne, %1, %c0_i32_0 : i32
    scf.if %2 {
      %cst_100 = arith.constant 0.000000e+00 : f32
      %119 = vector.broadcast %cst_100 : f32 to vector<14x128xf32>
      %c0_101 = arith.constant 0 : index
      %c0_102 = arith.constant 0 : index
      %c0_103 = arith.constant 0 : index
      %120 = vector.load %arg3[%c0_101, %c0_102, %c0_103] : memref<1x14x128xf32, #tpu.memory_space<vmem>>, vector<1x14x128xf32>
      %121 = vector.shape_cast %120 : vector<1x14x128xf32> to vector<14x128xf32>
      %122 = vector.shape_cast %119 : vector<14x128xf32> to vector<1x14x128xf32>
      tpu.vector_store %arg3[%c0_101, %c0_102, %c0_103], %122 {strides = array<i32>} : memref<1x14x128xf32, #tpu.memory_space<vmem>>, vector<1x14x128xf32>,
    } else {
    }
    %c0 = arith.constant 0 : index
    %c0_1 = arith.constant 0 : index
    %c0_2 = arith.constant 0 : index
    %c0_3 = arith.constant 0 : index
    %3 = vector.load %arg2[%c0, %c0_1, %c0_2, %c0_3] : memref<1x4x2x128xf32, #tpu.memory_space<vmem>>, vector<1x1x2x128xf32>
    %4 = vector.shape_cast %3 : vector<1x1x2x128xf32> to vector<2x128xf32>
    %c0_4 = arith.constant 0 : index
    %c1 = arith.constant 1 : index
    %c0_5 = arith.constant 0 : index
    %c0_6 = arith.constant 0 : index
    %5 = vector.load %arg2[%c0_4, %c1, %c0_5, %c0_6] : memref<1x4x2x128xf32, #tpu.memory_space<vmem>>, vector<1x1x2x128xf32>
    %6 = vector.shape_cast %5 : vector<1x1x2x128xf32> to vector<2x128xf32>
    %c0_7 = arith.constant 0 : index
    %c2 = arith.constant 2 : index
    %c0_8 = arith.constant 0 : index
    %c0_9 = arith.constant 0 : index
    %7 = vector.load %arg2[%c0_7, %c2, %c0_8, %c0_9] : memref<1x4x2x128xf32, #tpu.memory_space<vmem>>, vector<1x1x2x128xf32>
    %8 = vector.shape_cast %7 : vector<1x1x2x128xf32> to vector<2x128xf32>
    %c0_10 = arith.constant 0 : index
    %c3 = arith.constant 3 : index
    %c0_11 = arith.constant 0 : index
    %c0_12 = arith.constant 0 : index
    %9 = vector.load %arg2[%c0_10, %c3, %c0_11, %c0_12] : memref<1x4x2x128xf32, #tpu.memory_space<vmem>>, vector<1x1x2x128xf32>
    %10 = vector.shape_cast %9 : vector<1x1x2x128xf32> to vector<2x128xf32>
    %c0_13 = arith.constant 0 : index
    %c0_14 = arith.constant 0 : index
    %c0_15 = arith.constant 0 : index
    %11 = vector.load %arg3[%c0_13, %c0_14, %c0_15] : memref<1x14x128xf32, #tpu.memory_space<vmem>>, vector<1x1x128xf32>
    %12 = vector.shape_cast %11 : vector<1x1x128xf32> to vector<128xf32>
    %cst = arith.constant dense<0.000000e+00> : vector<128xf32>
    %13 = vector.multi_reduction <add>, %4, %cst [0] : vector<2x128xf32> to vector<128xf32>
    %14 = arith.addf %12, %13 : vector<128xf32>
    %c0_16 = arith.constant 0 : index
    %c0_17 = arith.constant 0 : index
    %c0_18 = arith.constant 0 : index
    %15 = vector.load %arg3[%c0_16, %c0_17, %c0_18] : memref<1x14x128xf32, #tpu.memory_space<vmem>>, vector<1x1x128xf32>
    %16 = vector.shape_cast %15 : vector<1x1x128xf32> to vector<128xf32>
    %17 = vector.shape_cast %14 : vector<128xf32> to vector<1x1x128xf32>
    tpu.vector_store %arg3[%c0_16, %c0_17, %c0_18], %17 {strides = array<i32>} : memref<1x14x128xf32, #tpu.memory_space<vmem>>, vector<1x1x128xf32>,
    %c0_19 = arith.constant 0 : index
    %c1_20 = arith.constant 1 : index
    %c0_21 = arith.constant 0 : index
    %18 = vector.load %arg3[%c0_19, %c1_20, %c0_21] : memref<1x14x128xf32, #tpu.memory_space<vmem>>, vector<1x1x128xf32>
    %19 = vector.shape_cast %18 : vector<1x1x128xf32> to vector<128xf32>
    %cst_22 = arith.constant dense<0.000000e+00> : vector<128xf32>
    %20 = vector.multi_reduction <add>, %6, %cst_22 [0] : vector<2x128xf32> to vector<128xf32>
    %21 = arith.addf %19, %20 : vector<128xf32>
    %c0_23 = arith.constant 0 : index
    %c1_24 = arith.constant 1 : index
    %c0_25 = arith.constant 0 : index
    %22 = vector.load %arg3[%c0_23, %c1_24, %c0_25] : memref<1x14x128xf32, #tpu.memory_space<vmem>>, vector<1x1x128xf32>
    %23 = vector.shape_cast %22 : vector<1x1x128xf32> to vector<128xf32>
    %24 = vector.shape_cast %21 : vector<128xf32> to vector<1x1x128xf32>
    tpu.vector_store %arg3[%c0_23, %c1_24, %c0_25], %24 {strides = array<i32>} : memref<1x14x128xf32, #tpu.memory_space<vmem>>, vector<1x1x128xf32>,
    %c0_26 = arith.constant 0 : index
    %c2_27 = arith.constant 2 : index
    %c0_28 = arith.constant 0 : index
    %25 = vector.load %arg3[%c0_26, %c2_27, %c0_28] : memref<1x14x128xf32, #tpu.memory_space<vmem>>, vector<1x1x128xf32>
    %26 = vector.shape_cast %25 : vector<1x1x128xf32> to vector<128xf32>
    %cst_29 = arith.constant dense<0.000000e+00> : vector<128xf32>
    %27 = vector.multi_reduction <add>, %8, %cst_29 [0] : vector<2x128xf32> to vector<128xf32>
    %28 = arith.addf %26, %27 : vector<128xf32>
    %c0_30 = arith.constant 0 : index
    %c2_31 = arith.constant 2 : index
    %c0_32 = arith.constant 0 : index
    %29 = vector.load %arg3[%c0_30, %c2_31, %c0_32] : memref<1x14x128xf32, #tpu.memory_space<vmem>>, vector<1x1x128xf32>
    %30 = vector.shape_cast %29 : vector<1x1x128xf32> to vector<128xf32>
    %31 = vector.shape_cast %28 : vector<128xf32> to vector<1x1x128xf32>
    tpu.vector_store %arg3[%c0_30, %c2_31, %c0_32], %31 {strides = array<i32>} : memref<1x14x128xf32, #tpu.memory_space<vmem>>, vector<1x1x128xf32>,
    %c0_33 = arith.constant 0 : index
    %c3_34 = arith.constant 3 : index
    %c0_35 = arith.constant 0 : index
    %32 = vector.load %arg3[%c0_33, %c3_34, %c0_35] : memref<1x14x128xf32, #tpu.memory_space<vmem>>, vector<1x1x128xf32>
    %33 = vector.shape_cast %32 : vector<1x1x128xf32> to vector<128xf32>
    %cst_36 = arith.constant dense<0.000000e+00> : vector<128xf32>
    %34 = vector.multi_reduction <add>, %10, %cst_36 [0] : vector<2x128xf32> to vector<128xf32>
    %35 = arith.addf %33, %34 : vector<128xf32>
    %c0_37 = arith.constant 0 : index
    %c3_38 = arith.constant 3 : index
    %c0_39 = arith.constant 0 : index
    %36 = vector.load %arg3[%c0_37, %c3_38, %c0_39] : memref<1x14x128xf32, #tpu.memory_space<vmem>>, vector<1x1x128xf32>
    %37 = vector.shape_cast %36 : vector<1x1x128xf32> to vector<128xf32>
    %38 = vector.shape_cast %35 : vector<128xf32> to vector<1x1x128xf32>
    tpu.vector_store %arg3[%c0_37, %c3_38, %c0_39], %38 {strides = array<i32>} : memref<1x14x128xf32, #tpu.memory_space<vmem>>, vector<1x1x128xf32>,
    %c0_40 = arith.constant 0 : index
    %c4 = arith.constant 4 : index
    %c0_41 = arith.constant 0 : index
    %39 = vector.load %arg3[%c0_40, %c4, %c0_41] : memref<1x14x128xf32, #tpu.memory_space<vmem>>, vector<1x1x128xf32>
    %40 = vector.shape_cast %39 : vector<1x1x128xf32> to vector<128xf32>
    %41 = arith.mulf %4, %4 : vector<2x128xf32>
    %cst_42 = arith.constant dense<0.000000e+00> : vector<128xf32>
    %42 = vector.multi_reduction <add>, %41, %cst_42 [0] : vector<2x128xf32> to vector<128xf32>
    %43 = arith.addf %40, %42 : vector<128xf32>
    %c0_43 = arith.constant 0 : index
    %c4_44 = arith.constant 4 : index
    %c0_45 = arith.constant 0 : index
    %44 = vector.load %arg3[%c0_43, %c4_44, %c0_45] : memref<1x14x128xf32, #tpu.memory_space<vmem>>, vector<1x1x128xf32>
    %45 = vector.shape_cast %44 : vector<1x1x128xf32> to vector<128xf32>
    %46 = vector.shape_cast %43 : vector<128xf32> to vector<1x1x128xf32>
    tpu.vector_store %arg3[%c0_43, %c4_44, %c0_45], %46 {strides = array<i32>} : memref<1x14x128xf32, #tpu.memory_space<vmem>>, vector<1x1x128xf32>,
    %c0_46 = arith.constant 0 : index
    %c5 = arith.constant 5 : index
    %c0_47 = arith.constant 0 : index
    %47 = vector.load %arg3[%c0_46, %c5, %c0_47] : memref<1x14x128xf32, #tpu.memory_space<vmem>>, vector<1x1x128xf32>
    %48 = vector.shape_cast %47 : vector<1x1x128xf32> to vector<128xf32>
    %49 = arith.mulf %4, %6 : vector<2x128xf32>
    %cst_48 = arith.constant dense<0.000000e+00> : vector<128xf32>
    %50 = vector.multi_reduction <add>, %49, %cst_48 [0] : vector<2x128xf32> to vector<128xf32>
    %51 = arith.addf %48, %50 : vector<128xf32>
    %c0_49 = arith.constant 0 : index
    %c5_50 = arith.constant 5 : index
    %c0_51 = arith.constant 0 : index
    %52 = vector.load %arg3[%c0_49, %c5_50, %c0_51] : memref<1x14x128xf32, #tpu.memory_space<vmem>>, vector<1x1x128xf32>
    %53 = vector.shape_cast %52 : vector<1x1x128xf32> to vector<128xf32>
    %54 = vector.shape_cast %51 : vector<128xf32> to vector<1x1x128xf32>
    tpu.vector_store %arg3[%c0_49, %c5_50, %c0_51], %54 {strides = array<i32>} : memref<1x14x128xf32, #tpu.memory_space<vmem>>, vector<1x1x128xf32>,
    %c0_52 = arith.constant 0 : index
    %c6 = arith.constant 6 : index
    %c0_53 = arith.constant 0 : index
    %55 = vector.load %arg3[%c0_52, %c6, %c0_53] : memref<1x14x128xf32, #tpu.memory_space<vmem>>, vector<1x1x128xf32>
    %56 = vector.shape_cast %55 : vector<1x1x128xf32> to vector<128xf32>
    %57 = arith.mulf %4, %8 : vector<2x128xf32>
    %cst_54 = arith.constant dense<0.000000e+00> : vector<128xf32>
    %58 = vector.multi_reduction <add>, %57, %cst_54 [0] : vector<2x128xf32> to vector<128xf32>
    %59 = arith.addf %56, %58 : vector<128xf32>
    %c0_55 = arith.constant 0 : index
    %c6_56 = arith.constant 6 : index
    %c0_57 = arith.constant 0 : index
    %60 = vector.load %arg3[%c0_55, %c6_56, %c0_57] : memref<1x14x128xf32, #tpu.memory_space<vmem>>, vector<1x1x128xf32>
    %61 = vector.shape_cast %60 : vector<1x1x128xf32> to vector<128xf32>
    %62 = vector.shape_cast %59 : vector<128xf32> to vector<1x1x128xf32>
    tpu.vector_store %arg3[%c0_55, %c6_56, %c0_57], %62 {strides = array<i32>} : memref<1x14x128xf32, #tpu.memory_space<vmem>>, vector<1x1x128xf32>,
    %c0_58 = arith.constant 0 : index
    %c7 = arith.constant 7 : index
    %c0_59 = arith.constant 0 : index
    %63 = vector.load %arg3[%c0_58, %c7, %c0_59] : memref<1x14x128xf32, #tpu.memory_space<vmem>>, vector<1x1x128xf32>
    %64 = vector.shape_cast %63 : vector<1x1x128xf32> to vector<128xf32>
    %65 = arith.mulf %4, %10 : vector<2x128xf32>
    %cst_60 = arith.constant dense<0.000000e+00> : vector<128xf32>
    %66 = vector.multi_reduction <add>, %65, %cst_60 [0] : vector<2x128xf32> to vector<128xf32>
    %67 = arith.addf %64, %66 : vector<128xf32>
    %c0_61 = arith.constant 0 : index
    %c7_62 = arith.constant 7 : index
    %c0_63 = arith.constant 0 : index
    %68 = vector.load %arg3[%c0_61, %c7_62, %c0_63] : memref<1x14x128xf32, #tpu.memory_space<vmem>>, vector<1x1x128xf32>
    %69 = vector.shape_cast %68 : vector<1x1x128xf32> to vector<128xf32>
    %70 = vector.shape_cast %67 : vector<128xf32> to vector<1x1x128xf32>
    tpu.vector_store %arg3[%c0_61, %c7_62, %c0_63], %70 {strides = array<i32>} : memref<1x14x128xf32, #tpu.memory_space<vmem>>, vector<1x1x128xf32>,
    %c0_64 = arith.constant 0 : index
    %c8 = arith.constant 8 : index
    %c0_65 = arith.constant 0 : index
    %71 = vector.load %arg3[%c0_64, %c8, %c0_65] : memref<1x14x128xf32, #tpu.memory_space<vmem>>, vector<1x1x128xf32>
    %72 = vector.shape_cast %71 : vector<1x1x128xf32> to vector<128xf32>
    %73 = arith.mulf %6, %6 : vector<2x128xf32>
    %cst_66 = arith.constant dense<0.000000e+00> : vector<128xf32>
    %74 = vector.multi_reduction <add>, %73, %cst_66 [0] : vector<2x128xf32> to vector<128xf32>
    %75 = arith.addf %72, %74 : vector<128xf32>
    %c0_67 = arith.constant 0 : index
    %c8_68 = arith.constant 8 : index
    %c0_69 = arith.constant 0 : index
    %76 = vector.load %arg3[%c0_67, %c8_68, %c0_69] : memref<1x14x128xf32, #tpu.memory_space<vmem>>, vector<1x1x128xf32>
    %77 = vector.shape_cast %76 : vector<1x1x128xf32> to vector<128xf32>
    %78 = vector.shape_cast %75 : vector<128xf32> to vector<1x1x128xf32>
    tpu.vector_store %arg3[%c0_67, %c8_68, %c0_69], %78 {strides = array<i32>} : memref<1x14x128xf32, #tpu.memory_space<vmem>>, vector<1x1x128xf32>,
    %c0_70 = arith.constant 0 : index
    %c9 = arith.constant 9 : index
    %c0_71 = arith.constant 0 : index
    %79 = vector.load %arg3[%c0_70, %c9, %c0_71] : memref<1x14x128xf32, #tpu.memory_space<vmem>>, vector<1x1x128xf32>
    %80 = vector.shape_cast %79 : vector<1x1x128xf32> to vector<128xf32>
    %81 = arith.mulf %6, %8 : vector<2x128xf32>
    %cst_72 = arith.constant dense<0.000000e+00> : vector<128xf32>
    %82 = vector.multi_reduction <add>, %81, %cst_72 [0] : vector<2x128xf32> to vector<128xf32>
    %83 = arith.addf %80, %82 : vector<128xf32>
    %c0_73 = arith.constant 0 : index
    %c9_74 = arith.constant 9 : index
    %c0_75 = arith.constant 0 : index
    %84 = vector.load %arg3[%c0_73, %c9_74, %c0_75] : memref<1x14x128xf32, #tpu.memory_space<vmem>>, vector<1x1x128xf32>
    %85 = vector.shape_cast %84 : vector<1x1x128xf32> to vector<128xf32>
    %86 = vector.shape_cast %83 : vector<128xf32> to vector<1x1x128xf32>
    tpu.vector_store %arg3[%c0_73, %c9_74, %c0_75], %86 {strides = array<i32>} : memref<1x14x128xf32, #tpu.memory_space<vmem>>, vector<1x1x128xf32>,
    %c0_76 = arith.constant 0 : index
    %c10 = arith.constant 10 : index
    %c0_77 = arith.constant 0 : index
    %87 = vector.load %arg3[%c0_76, %c10, %c0_77] : memref<1x14x128xf32, #tpu.memory_space<vmem>>, vector<1x1x128xf32>
    %88 = vector.shape_cast %87 : vector<1x1x128xf32> to vector<128xf32>
    %89 = arith.mulf %6, %10 : vector<2x128xf32>
    %cst_78 = arith.constant dense<0.000000e+00> : vector<128xf32>
    %90 = vector.multi_reduction <add>, %89, %cst_78 [0] : vector<2x128xf32> to vector<128xf32>
    %91 = arith.addf %88, %90 : vector<128xf32>
    %c0_79 = arith.constant 0 : index
    %c10_80 = arith.constant 10 : index
    %c0_81 = arith.constant 0 : index
    %92 = vector.load %arg3[%c0_79, %c10_80, %c0_81] : memref<1x14x128xf32, #tpu.memory_space<vmem>>, vector<1x1x128xf32>
    %93 = vector.shape_cast %92 : vector<1x1x128xf32> to vector<128xf32>
    %94 = vector.shape_cast %91 : vector<128xf32> to vector<1x1x128xf32>
    tpu.vector_store %arg3[%c0_79, %c10_80, %c0_81], %94 {strides = array<i32>} : memref<1x14x128xf32, #tpu.memory_space<vmem>>, vector<1x1x128xf32>,
    %c0_82 = arith.constant 0 : index
    %c11 = arith.constant 11 : index
    %c0_83 = arith.constant 0 : index
    %95 = vector.load %arg3[%c0_82, %c11, %c0_83] : memref<1x14x128xf32, #tpu.memory_space<vmem>>, vector<1x1x128xf32>
    %96 = vector.shape_cast %95 : vector<1x1x128xf32> to vector<128xf32>
    %97 = arith.mulf %8, %8 : vector<2x128xf32>
    %cst_84 = arith.constant dense<0.000000e+00> : vector<128xf32>
    %98 = vector.multi_reduction <add>, %97, %cst_84 [0] : vector<2x128xf32> to vector<128xf32>
    %99 = arith.addf %96, %98 : vector<128xf32>
    %c0_85 = arith.constant 0 : index
    %c11_86 = arith.constant 11 : index
    %c0_87 = arith.constant 0 : index
    %100 = vector.load %arg3[%c0_85, %c11_86, %c0_87] : memref<1x14x128xf32, #tpu.memory_space<vmem>>, vector<1x1x128xf32>
    %101 = vector.shape_cast %100 : vector<1x1x128xf32> to vector<128xf32>
    %102 = vector.shape_cast %99 : vector<128xf32> to vector<1x1x128xf32>
    tpu.vector_store %arg3[%c0_85, %c11_86, %c0_87], %102 {strides = array<i32>} : memref<1x14x128xf32, #tpu.memory_space<vmem>>, vector<1x1x128xf32>,
    %c0_88 = arith.constant 0 : index
    %c12 = arith.constant 12 : index
    %c0_89 = arith.constant 0 : index
    %103 = vector.load %arg3[%c0_88, %c12, %c0_89] : memref<1x14x128xf32, #tpu.memory_space<vmem>>, vector<1x1x128xf32>
    %104 = vector.shape_cast %103 : vector<1x1x128xf32> to vector<128xf32>
    %105 = arith.mulf %8, %10 : vector<2x128xf32>
    %cst_90 = arith.constant dense<0.000000e+00> : vector<128xf32>
    %106 = vector.multi_reduction <add>, %105, %cst_90 [0] : vector<2x128xf32> to vector<128xf32>
    %107 = arith.addf %104, %106 : vector<128xf32>
    %c0_91 = arith.constant 0 : index
    %c12_92 = arith.constant 12 : index
    %c0_93 = arith.constant 0 : index
    %108 = vector.load %arg3[%c0_91, %c12_92, %c0_93] : memref<1x14x128xf32, #tpu.memory_space<vmem>>, vector<1x1x128xf32>
    %109 = vector.shape_cast %108 : vector<1x1x128xf32> to vector<128xf32>
    %110 = vector.shape_cast %107 : vector<128xf32> to vector<1x1x128xf32>
    tpu.vector_store %arg3[%c0_91, %c12_92, %c0_93], %110 {strides = array<i32>} : memref<1x14x128xf32, #tpu.memory_space<vmem>>, vector<1x1x128xf32>,
    %c0_94 = arith.constant 0 : index
    %c13 = arith.constant 13 : index
    %c0_95 = arith.constant 0 : index
    %111 = vector.load %arg3[%c0_94, %c13, %c0_95] : memref<1x14x128xf32, #tpu.memory_space<vmem>>, vector<1x1x128xf32>
    %112 = vector.shape_cast %111 : vector<1x1x128xf32> to vector<128xf32>
    %113 = arith.mulf %10, %10 : vector<2x128xf32>
    %cst_96 = arith.constant dense<0.000000e+00> : vector<128xf32>
    %114 = vector.multi_reduction <add>, %113, %cst_96 [0] : vector<2x128xf32> to vector<128xf32>
    %115 = arith.addf %112, %114 : vector<128xf32>
    %c0_97 = arith.constant 0 : index
    %c13_98 = arith.constant 13 : index
    %c0_99 = arith.constant 0 : index
    %116 = vector.load %arg3[%c0_97, %c13_98, %c0_99] : memref<1x14x128xf32, #tpu.memory_space<vmem>>, vector<1x1x128xf32>
    %117 = vector.shape_cast %116 : vector<1x1x128xf32> to vector<128xf32>
    %118 = vector.shape_cast %115 : vector<128xf32> to vector<1x1x128xf32>
    tpu.vector_store %arg3[%c0_97, %c13_98, %c0_99], %118 {strides = array<i32>} : memref<1x14x128xf32, #tpu.memory_space<vmem>>, vector<1x1x128xf32>,
    return
  }
  func.func @transform_0(%arg0: i32, %arg1: i32) -> (i32, i32, i32, i32) {
    %c0_i32 = arith.constant 0 : i32
    %c0_i32_0 = arith.constant 0 : i32
    %c0_i32_1 = arith.constant 0 : i32
    return %arg0, %c0_i32, %arg1, %c0_i32_0 : i32, i32, i32, i32
  }
  func.func @transform_1(%arg0: i32, %arg1: i32) -> (i32, i32, i32) {
    %c0_i32 = arith.constant 0 : i32
    %c0_i32_0 = arith.constant 0 : i32
    %c0_i32_1 = arith.constant 0 : i32
    return %arg0, %c0_i32, %c0_i32_0 : i32, i32, i32
  }
}

module attributes {stable_mosaic.version = 11 : i64} {
  func.func @_apply_kernel(%arg0: i32, %arg1: i32, %arg2: memref<8x4xf32, #tpu.memory_space<smem>>, %arg3: memref<8xf32, #tpu.memory_space<smem>>, %arg4: memref<1x4x2x128xf32, #tpu.memory_space<vmem>>, %arg5: memref<1x8x2x128xf32, #tpu.memory_space<vmem>>) attributes {dimension_semantics = [#tpu.dimension_semantics<parallel>, #tpu.dimension_semantics<parallel>], iteration_bounds = array<i64: 2, 1>, scalar_prefetch = 0 : i64, scratch_operands = 0 : i64, tpu.core_type = #tpu.core_type<tc>, window_params = [{transform_indices = @transform_0, window_bounds = array<i64: 8, 4>}, {transform_indices = @transform_1, window_bounds = array<i64: 8>}, {transform_indices = @transform_2, window_bounds = array<i64: 1, 4, 2, 128>}, {transform_indices = @transform_3, window_bounds = array<i64: 1, 8, 2, 128>}]} {
    %c0 = arith.constant 0 : index
    %c0_0 = arith.constant 0 : index
    %c0_1 = arith.constant 0 : index
    %c0_2 = arith.constant 0 : index
    %0 = vector.load %arg4[%c0, %c0_0, %c0_1, %c0_2] : memref<1x4x2x128xf32, #tpu.memory_space<vmem>>, vector<1x1x2x128xf32>
    %1 = vector.shape_cast %0 : vector<1x1x2x128xf32> to vector<2x128xf32>
    %c0_3 = arith.constant 0 : index
    %c1 = arith.constant 1 : index
    %c0_4 = arith.constant 0 : index
    %c0_5 = arith.constant 0 : index
    %2 = vector.load %arg4[%c0_3, %c1, %c0_4, %c0_5] : memref<1x4x2x128xf32, #tpu.memory_space<vmem>>, vector<1x1x2x128xf32>
    %3 = vector.shape_cast %2 : vector<1x1x2x128xf32> to vector<2x128xf32>
    %c0_6 = arith.constant 0 : index
    %c2 = arith.constant 2 : index
    %c0_7 = arith.constant 0 : index
    %c0_8 = arith.constant 0 : index
    %4 = vector.load %arg4[%c0_6, %c2, %c0_7, %c0_8] : memref<1x4x2x128xf32, #tpu.memory_space<vmem>>, vector<1x1x2x128xf32>
    %5 = vector.shape_cast %4 : vector<1x1x2x128xf32> to vector<2x128xf32>
    %c0_9 = arith.constant 0 : index
    %c3 = arith.constant 3 : index
    %c0_10 = arith.constant 0 : index
    %c0_11 = arith.constant 0 : index
    %6 = vector.load %arg4[%c0_9, %c3, %c0_10, %c0_11] : memref<1x4x2x128xf32, #tpu.memory_space<vmem>>, vector<1x1x2x128xf32>
    %7 = vector.shape_cast %6 : vector<1x1x2x128xf32> to vector<2x128xf32>
    %c0_12 = arith.constant 0 : index
    %c0_13 = arith.constant 0 : index
    %8 = memref.load %arg2[%c0_12, %c0_13] : memref<8x4xf32, #tpu.memory_space<smem>>
    %9 = vector.broadcast %8 : f32 to vector<2x128xf32>
    %10 = arith.mulf %1, %9 : vector<2x128xf32>
    %c0_14 = arith.constant 0 : index
    %c1_15 = arith.constant 1 : index
    %11 = memref.load %arg2[%c0_14, %c1_15] : memref<8x4xf32, #tpu.memory_space<smem>>
    %12 = vector.broadcast %11 : f32 to vector<2x128xf32>
    %13 = arith.mulf %3, %12 : vector<2x128xf32>
    %14 = arith.addf %10, %13 : vector<2x128xf32>
    %c0_16 = arith.constant 0 : index
    %c2_17 = arith.constant 2 : index
    %15 = memref.load %arg2[%c0_16, %c2_17] : memref<8x4xf32, #tpu.memory_space<smem>>
    %16 = vector.broadcast %15 : f32 to vector<2x128xf32>
    %17 = arith.mulf %5, %16 : vector<2x128xf32>
    %18 = arith.addf %14, %17 : vector<2x128xf32>
    %c0_18 = arith.constant 0 : index
    %c3_19 = arith.constant 3 : index
    %19 = memref.load %arg2[%c0_18, %c3_19] : memref<8x4xf32, #tpu.memory_space<smem>>
    %20 = vector.broadcast %19 : f32 to vector<2x128xf32>
    %21 = arith.mulf %7, %20 : vector<2x128xf32>
    %22 = arith.addf %18, %21 : vector<2x128xf32>
    %c0_20 = arith.constant 0 : index
    %23 = memref.load %arg3[%c0_20] : memref<8xf32, #tpu.memory_space<smem>>
    %24 = vector.broadcast %23 : f32 to vector<2x128xf32>
    %25 = arith.addf %22, %24 : vector<2x128xf32>
    %cst = arith.constant 0.000000e+00 : f32
    %26 = vector.broadcast %cst : f32 to vector<2x128xf32>
    %27 = arith.maximumf %25, %26 : vector<2x128xf32>
    %c0_21 = arith.constant 0 : index
    %c0_22 = arith.constant 0 : index
    %c0_23 = arith.constant 0 : index
    %c0_24 = arith.constant 0 : index
    %28 = vector.load %arg5[%c0_21, %c0_22, %c0_23, %c0_24] : memref<1x8x2x128xf32, #tpu.memory_space<vmem>>, vector<1x1x2x128xf32>
    %29 = vector.shape_cast %28 : vector<1x1x2x128xf32> to vector<2x128xf32>
    %30 = vector.shape_cast %27 : vector<2x128xf32> to vector<1x1x2x128xf32>
    tpu.vector_store %arg5[%c0_21, %c0_22, %c0_23, %c0_24], %30 {strides = array<i32>} : memref<1x8x2x128xf32, #tpu.memory_space<vmem>>, vector<1x1x2x128xf32>,
    %c1_25 = arith.constant 1 : index
    %c0_26 = arith.constant 0 : index
    %31 = memref.load %arg2[%c1_25, %c0_26] : memref<8x4xf32, #tpu.memory_space<smem>>
    %32 = vector.broadcast %31 : f32 to vector<2x128xf32>
    %33 = arith.mulf %1, %32 : vector<2x128xf32>
    %c1_27 = arith.constant 1 : index
    %c1_28 = arith.constant 1 : index
    %34 = memref.load %arg2[%c1_27, %c1_28] : memref<8x4xf32, #tpu.memory_space<smem>>
    %35 = vector.broadcast %34 : f32 to vector<2x128xf32>
    %36 = arith.mulf %3, %35 : vector<2x128xf32>
    %37 = arith.addf %33, %36 : vector<2x128xf32>
    %c1_29 = arith.constant 1 : index
    %c2_30 = arith.constant 2 : index
    %38 = memref.load %arg2[%c1_29, %c2_30] : memref<8x4xf32, #tpu.memory_space<smem>>
    %39 = vector.broadcast %38 : f32 to vector<2x128xf32>
    %40 = arith.mulf %5, %39 : vector<2x128xf32>
    %41 = arith.addf %37, %40 : vector<2x128xf32>
    %c1_31 = arith.constant 1 : index
    %c3_32 = arith.constant 3 : index
    %42 = memref.load %arg2[%c1_31, %c3_32] : memref<8x4xf32, #tpu.memory_space<smem>>
    %43 = vector.broadcast %42 : f32 to vector<2x128xf32>
    %44 = arith.mulf %7, %43 : vector<2x128xf32>
    %45 = arith.addf %41, %44 : vector<2x128xf32>
    %c1_33 = arith.constant 1 : index
    %46 = memref.load %arg3[%c1_33] : memref<8xf32, #tpu.memory_space<smem>>
    %47 = vector.broadcast %46 : f32 to vector<2x128xf32>
    %48 = arith.addf %45, %47 : vector<2x128xf32>
    %cst_34 = arith.constant 0.000000e+00 : f32
    %49 = vector.broadcast %cst_34 : f32 to vector<2x128xf32>
    %50 = arith.maximumf %48, %49 : vector<2x128xf32>
    %c0_35 = arith.constant 0 : index
    %c1_36 = arith.constant 1 : index
    %c0_37 = arith.constant 0 : index
    %c0_38 = arith.constant 0 : index
    %51 = vector.load %arg5[%c0_35, %c1_36, %c0_37, %c0_38] : memref<1x8x2x128xf32, #tpu.memory_space<vmem>>, vector<1x1x2x128xf32>
    %52 = vector.shape_cast %51 : vector<1x1x2x128xf32> to vector<2x128xf32>
    %53 = vector.shape_cast %50 : vector<2x128xf32> to vector<1x1x2x128xf32>
    tpu.vector_store %arg5[%c0_35, %c1_36, %c0_37, %c0_38], %53 {strides = array<i32>} : memref<1x8x2x128xf32, #tpu.memory_space<vmem>>, vector<1x1x2x128xf32>,
    %c2_39 = arith.constant 2 : index
    %c0_40 = arith.constant 0 : index
    %54 = memref.load %arg2[%c2_39, %c0_40] : memref<8x4xf32, #tpu.memory_space<smem>>
    %55 = vector.broadcast %54 : f32 to vector<2x128xf32>
    %56 = arith.mulf %1, %55 : vector<2x128xf32>
    %c2_41 = arith.constant 2 : index
    %c1_42 = arith.constant 1 : index
    %57 = memref.load %arg2[%c2_41, %c1_42] : memref<8x4xf32, #tpu.memory_space<smem>>
    %58 = vector.broadcast %57 : f32 to vector<2x128xf32>
    %59 = arith.mulf %3, %58 : vector<2x128xf32>
    %60 = arith.addf %56, %59 : vector<2x128xf32>
    %c2_43 = arith.constant 2 : index
    %c2_44 = arith.constant 2 : index
    %61 = memref.load %arg2[%c2_43, %c2_44] : memref<8x4xf32, #tpu.memory_space<smem>>
    %62 = vector.broadcast %61 : f32 to vector<2x128xf32>
    %63 = arith.mulf %5, %62 : vector<2x128xf32>
    %64 = arith.addf %60, %63 : vector<2x128xf32>
    %c2_45 = arith.constant 2 : index
    %c3_46 = arith.constant 3 : index
    %65 = memref.load %arg2[%c2_45, %c3_46] : memref<8x4xf32, #tpu.memory_space<smem>>
    %66 = vector.broadcast %65 : f32 to vector<2x128xf32>
    %67 = arith.mulf %7, %66 : vector<2x128xf32>
    %68 = arith.addf %64, %67 : vector<2x128xf32>
    %c2_47 = arith.constant 2 : index
    %69 = memref.load %arg3[%c2_47] : memref<8xf32, #tpu.memory_space<smem>>
    %70 = vector.broadcast %69 : f32 to vector<2x128xf32>
    %71 = arith.addf %68, %70 : vector<2x128xf32>
    %cst_48 = arith.constant 0.000000e+00 : f32
    %72 = vector.broadcast %cst_48 : f32 to vector<2x128xf32>
    %73 = arith.maximumf %71, %72 : vector<2x128xf32>
    %c0_49 = arith.constant 0 : index
    %c2_50 = arith.constant 2 : index
    %c0_51 = arith.constant 0 : index
    %c0_52 = arith.constant 0 : index
    %74 = vector.load %arg5[%c0_49, %c2_50, %c0_51, %c0_52] : memref<1x8x2x128xf32, #tpu.memory_space<vmem>>, vector<1x1x2x128xf32>
    %75 = vector.shape_cast %74 : vector<1x1x2x128xf32> to vector<2x128xf32>
    %76 = vector.shape_cast %73 : vector<2x128xf32> to vector<1x1x2x128xf32>
    tpu.vector_store %arg5[%c0_49, %c2_50, %c0_51, %c0_52], %76 {strides = array<i32>} : memref<1x8x2x128xf32, #tpu.memory_space<vmem>>, vector<1x1x2x128xf32>,
    %c3_53 = arith.constant 3 : index
    %c0_54 = arith.constant 0 : index
    %77 = memref.load %arg2[%c3_53, %c0_54] : memref<8x4xf32, #tpu.memory_space<smem>>
    %78 = vector.broadcast %77 : f32 to vector<2x128xf32>
    %79 = arith.mulf %1, %78 : vector<2x128xf32>
    %c3_55 = arith.constant 3 : index
    %c1_56 = arith.constant 1 : index
    %80 = memref.load %arg2[%c3_55, %c1_56] : memref<8x4xf32, #tpu.memory_space<smem>>
    %81 = vector.broadcast %80 : f32 to vector<2x128xf32>
    %82 = arith.mulf %3, %81 : vector<2x128xf32>
    %83 = arith.addf %79, %82 : vector<2x128xf32>
    %c3_57 = arith.constant 3 : index
    %c2_58 = arith.constant 2 : index
    %84 = memref.load %arg2[%c3_57, %c2_58] : memref<8x4xf32, #tpu.memory_space<smem>>
    %85 = vector.broadcast %84 : f32 to vector<2x128xf32>
    %86 = arith.mulf %5, %85 : vector<2x128xf32>
    %87 = arith.addf %83, %86 : vector<2x128xf32>
    %c3_59 = arith.constant 3 : index
    %c3_60 = arith.constant 3 : index
    %88 = memref.load %arg2[%c3_59, %c3_60] : memref<8x4xf32, #tpu.memory_space<smem>>
    %89 = vector.broadcast %88 : f32 to vector<2x128xf32>
    %90 = arith.mulf %7, %89 : vector<2x128xf32>
    %91 = arith.addf %87, %90 : vector<2x128xf32>
    %c3_61 = arith.constant 3 : index
    %92 = memref.load %arg3[%c3_61] : memref<8xf32, #tpu.memory_space<smem>>
    %93 = vector.broadcast %92 : f32 to vector<2x128xf32>
    %94 = arith.addf %91, %93 : vector<2x128xf32>
    %cst_62 = arith.constant 0.000000e+00 : f32
    %95 = vector.broadcast %cst_62 : f32 to vector<2x128xf32>
    %96 = arith.maximumf %94, %95 : vector<2x128xf32>
    %c0_63 = arith.constant 0 : index
    %c3_64 = arith.constant 3 : index
    %c0_65 = arith.constant 0 : index
    %c0_66 = arith.constant 0 : index
    %97 = vector.load %arg5[%c0_63, %c3_64, %c0_65, %c0_66] : memref<1x8x2x128xf32, #tpu.memory_space<vmem>>, vector<1x1x2x128xf32>
    %98 = vector.shape_cast %97 : vector<1x1x2x128xf32> to vector<2x128xf32>
    %99 = vector.shape_cast %96 : vector<2x128xf32> to vector<1x1x2x128xf32>
    tpu.vector_store %arg5[%c0_63, %c3_64, %c0_65, %c0_66], %99 {strides = array<i32>} : memref<1x8x2x128xf32, #tpu.memory_space<vmem>>, vector<1x1x2x128xf32>,
    %c4 = arith.constant 4 : index
    %c0_67 = arith.constant 0 : index
    %100 = memref.load %arg2[%c4, %c0_67] : memref<8x4xf32, #tpu.memory_space<smem>>
    %101 = vector.broadcast %100 : f32 to vector<2x128xf32>
    %102 = arith.mulf %1, %101 : vector<2x128xf32>
    %c4_68 = arith.constant 4 : index
    %c1_69 = arith.constant 1 : index
    %103 = memref.load %arg2[%c4_68, %c1_69] : memref<8x4xf32, #tpu.memory_space<smem>>
    %104 = vector.broadcast %103 : f32 to vector<2x128xf32>
    %105 = arith.mulf %3, %104 : vector<2x128xf32>
    %106 = arith.addf %102, %105 : vector<2x128xf32>
    %c4_70 = arith.constant 4 : index
    %c2_71 = arith.constant 2 : index
    %107 = memref.load %arg2[%c4_70, %c2_71] : memref<8x4xf32, #tpu.memory_space<smem>>
    %108 = vector.broadcast %107 : f32 to vector<2x128xf32>
    %109 = arith.mulf %5, %108 : vector<2x128xf32>
    %110 = arith.addf %106, %109 : vector<2x128xf32>
    %c4_72 = arith.constant 4 : index
    %c3_73 = arith.constant 3 : index
    %111 = memref.load %arg2[%c4_72, %c3_73] : memref<8x4xf32, #tpu.memory_space<smem>>
    %112 = vector.broadcast %111 : f32 to vector<2x128xf32>
    %113 = arith.mulf %7, %112 : vector<2x128xf32>
    %114 = arith.addf %110, %113 : vector<2x128xf32>
    %c4_74 = arith.constant 4 : index
    %115 = memref.load %arg3[%c4_74] : memref<8xf32, #tpu.memory_space<smem>>
    %116 = vector.broadcast %115 : f32 to vector<2x128xf32>
    %117 = arith.addf %114, %116 : vector<2x128xf32>
    %cst_75 = arith.constant 0.000000e+00 : f32
    %118 = vector.broadcast %cst_75 : f32 to vector<2x128xf32>
    %119 = arith.maximumf %117, %118 : vector<2x128xf32>
    %c0_76 = arith.constant 0 : index
    %c4_77 = arith.constant 4 : index
    %c0_78 = arith.constant 0 : index
    %c0_79 = arith.constant 0 : index
    %120 = vector.load %arg5[%c0_76, %c4_77, %c0_78, %c0_79] : memref<1x8x2x128xf32, #tpu.memory_space<vmem>>, vector<1x1x2x128xf32>
    %121 = vector.shape_cast %120 : vector<1x1x2x128xf32> to vector<2x128xf32>
    %122 = vector.shape_cast %119 : vector<2x128xf32> to vector<1x1x2x128xf32>
    tpu.vector_store %arg5[%c0_76, %c4_77, %c0_78, %c0_79], %122 {strides = array<i32>} : memref<1x8x2x128xf32, #tpu.memory_space<vmem>>, vector<1x1x2x128xf32>,
    %c5 = arith.constant 5 : index
    %c0_80 = arith.constant 0 : index
    %123 = memref.load %arg2[%c5, %c0_80] : memref<8x4xf32, #tpu.memory_space<smem>>
    %124 = vector.broadcast %123 : f32 to vector<2x128xf32>
    %125 = arith.mulf %1, %124 : vector<2x128xf32>
    %c5_81 = arith.constant 5 : index
    %c1_82 = arith.constant 1 : index
    %126 = memref.load %arg2[%c5_81, %c1_82] : memref<8x4xf32, #tpu.memory_space<smem>>
    %127 = vector.broadcast %126 : f32 to vector<2x128xf32>
    %128 = arith.mulf %3, %127 : vector<2x128xf32>
    %129 = arith.addf %125, %128 : vector<2x128xf32>
    %c5_83 = arith.constant 5 : index
    %c2_84 = arith.constant 2 : index
    %130 = memref.load %arg2[%c5_83, %c2_84] : memref<8x4xf32, #tpu.memory_space<smem>>
    %131 = vector.broadcast %130 : f32 to vector<2x128xf32>
    %132 = arith.mulf %5, %131 : vector<2x128xf32>
    %133 = arith.addf %129, %132 : vector<2x128xf32>
    %c5_85 = arith.constant 5 : index
    %c3_86 = arith.constant 3 : index
    %134 = memref.load %arg2[%c5_85, %c3_86] : memref<8x4xf32, #tpu.memory_space<smem>>
    %135 = vector.broadcast %134 : f32 to vector<2x128xf32>
    %136 = arith.mulf %7, %135 : vector<2x128xf32>
    %137 = arith.addf %133, %136 : vector<2x128xf32>
    %c5_87 = arith.constant 5 : index
    %138 = memref.load %arg3[%c5_87] : memref<8xf32, #tpu.memory_space<smem>>
    %139 = vector.broadcast %138 : f32 to vector<2x128xf32>
    %140 = arith.addf %137, %139 : vector<2x128xf32>
    %cst_88 = arith.constant 0.000000e+00 : f32
    %141 = vector.broadcast %cst_88 : f32 to vector<2x128xf32>
    %142 = arith.maximumf %140, %141 : vector<2x128xf32>
    %c0_89 = arith.constant 0 : index
    %c5_90 = arith.constant 5 : index
    %c0_91 = arith.constant 0 : index
    %c0_92 = arith.constant 0 : index
    %143 = vector.load %arg5[%c0_89, %c5_90, %c0_91, %c0_92] : memref<1x8x2x128xf32, #tpu.memory_space<vmem>>, vector<1x1x2x128xf32>
    %144 = vector.shape_cast %143 : vector<1x1x2x128xf32> to vector<2x128xf32>
    %145 = vector.shape_cast %142 : vector<2x128xf32> to vector<1x1x2x128xf32>
    tpu.vector_store %arg5[%c0_89, %c5_90, %c0_91, %c0_92], %145 {strides = array<i32>} : memref<1x8x2x128xf32, #tpu.memory_space<vmem>>, vector<1x1x2x128xf32>,
    %c6 = arith.constant 6 : index
    %c0_93 = arith.constant 0 : index
    %146 = memref.load %arg2[%c6, %c0_93] : memref<8x4xf32, #tpu.memory_space<smem>>
    %147 = vector.broadcast %146 : f32 to vector<2x128xf32>
    %148 = arith.mulf %1, %147 : vector<2x128xf32>
    %c6_94 = arith.constant 6 : index
    %c1_95 = arith.constant 1 : index
    %149 = memref.load %arg2[%c6_94, %c1_95] : memref<8x4xf32, #tpu.memory_space<smem>>
    %150 = vector.broadcast %149 : f32 to vector<2x128xf32>
    %151 = arith.mulf %3, %150 : vector<2x128xf32>
    %152 = arith.addf %148, %151 : vector<2x128xf32>
    %c6_96 = arith.constant 6 : index
    %c2_97 = arith.constant 2 : index
    %153 = memref.load %arg2[%c6_96, %c2_97] : memref<8x4xf32, #tpu.memory_space<smem>>
    %154 = vector.broadcast %153 : f32 to vector<2x128xf32>
    %155 = arith.mulf %5, %154 : vector<2x128xf32>
    %156 = arith.addf %152, %155 : vector<2x128xf32>
    %c6_98 = arith.constant 6 : index
    %c3_99 = arith.constant 3 : index
    %157 = memref.load %arg2[%c6_98, %c3_99] : memref<8x4xf32, #tpu.memory_space<smem>>
    %158 = vector.broadcast %157 : f32 to vector<2x128xf32>
    %159 = arith.mulf %7, %158 : vector<2x128xf32>
    %160 = arith.addf %156, %159 : vector<2x128xf32>
    %c6_100 = arith.constant 6 : index
    %161 = memref.load %arg3[%c6_100] : memref<8xf32, #tpu.memory_space<smem>>
    %162 = vector.broadcast %161 : f32 to vector<2x128xf32>
    %163 = arith.addf %160, %162 : vector<2x128xf32>
    %cst_101 = arith.constant 0.000000e+00 : f32
    %164 = vector.broadcast %cst_101 : f32 to vector<2x128xf32>
    %165 = arith.maximumf %163, %164 : vector<2x128xf32>
    %c0_102 = arith.constant 0 : index
    %c6_103 = arith.constant 6 : index
    %c0_104 = arith.constant 0 : index
    %c0_105 = arith.constant 0 : index
    %166 = vector.load %arg5[%c0_102, %c6_103, %c0_104, %c0_105] : memref<1x8x2x128xf32, #tpu.memory_space<vmem>>, vector<1x1x2x128xf32>
    %167 = vector.shape_cast %166 : vector<1x1x2x128xf32> to vector<2x128xf32>
    %168 = vector.shape_cast %165 : vector<2x128xf32> to vector<1x1x2x128xf32>
    tpu.vector_store %arg5[%c0_102, %c6_103, %c0_104, %c0_105], %168 {strides = array<i32>} : memref<1x8x2x128xf32, #tpu.memory_space<vmem>>, vector<1x1x2x128xf32>,
    %c7 = arith.constant 7 : index
    %c0_106 = arith.constant 0 : index
    %169 = memref.load %arg2[%c7, %c0_106] : memref<8x4xf32, #tpu.memory_space<smem>>
    %170 = vector.broadcast %169 : f32 to vector<2x128xf32>
    %171 = arith.mulf %1, %170 : vector<2x128xf32>
    %c7_107 = arith.constant 7 : index
    %c1_108 = arith.constant 1 : index
    %172 = memref.load %arg2[%c7_107, %c1_108] : memref<8x4xf32, #tpu.memory_space<smem>>
    %173 = vector.broadcast %172 : f32 to vector<2x128xf32>
    %174 = arith.mulf %3, %173 : vector<2x128xf32>
    %175 = arith.addf %171, %174 : vector<2x128xf32>
    %c7_109 = arith.constant 7 : index
    %c2_110 = arith.constant 2 : index
    %176 = memref.load %arg2[%c7_109, %c2_110] : memref<8x4xf32, #tpu.memory_space<smem>>
    %177 = vector.broadcast %176 : f32 to vector<2x128xf32>
    %178 = arith.mulf %5, %177 : vector<2x128xf32>
    %179 = arith.addf %175, %178 : vector<2x128xf32>
    %c7_111 = arith.constant 7 : index
    %c3_112 = arith.constant 3 : index
    %180 = memref.load %arg2[%c7_111, %c3_112] : memref<8x4xf32, #tpu.memory_space<smem>>
    %181 = vector.broadcast %180 : f32 to vector<2x128xf32>
    %182 = arith.mulf %7, %181 : vector<2x128xf32>
    %183 = arith.addf %179, %182 : vector<2x128xf32>
    %c7_113 = arith.constant 7 : index
    %184 = memref.load %arg3[%c7_113] : memref<8xf32, #tpu.memory_space<smem>>
    %185 = vector.broadcast %184 : f32 to vector<2x128xf32>
    %186 = arith.addf %183, %185 : vector<2x128xf32>
    %cst_114 = arith.constant 0.000000e+00 : f32
    %187 = vector.broadcast %cst_114 : f32 to vector<2x128xf32>
    %188 = arith.maximumf %186, %187 : vector<2x128xf32>
    %c0_115 = arith.constant 0 : index
    %c7_116 = arith.constant 7 : index
    %c0_117 = arith.constant 0 : index
    %c0_118 = arith.constant 0 : index
    %189 = vector.load %arg5[%c0_115, %c7_116, %c0_117, %c0_118] : memref<1x8x2x128xf32, #tpu.memory_space<vmem>>, vector<1x1x2x128xf32>
    %190 = vector.shape_cast %189 : vector<1x1x2x128xf32> to vector<2x128xf32>
    %191 = vector.shape_cast %188 : vector<2x128xf32> to vector<1x1x2x128xf32>
    tpu.vector_store %arg5[%c0_115, %c7_116, %c0_117, %c0_118], %191 {strides = array<i32>} : memref<1x8x2x128xf32, #tpu.memory_space<vmem>>, vector<1x1x2x128xf32>,
    return
  }
  func.func @transform_0(%arg0: i32, %arg1: i32) -> (i32, i32) {
    %c0_i32 = arith.constant 0 : i32
    %c0_i32_0 = arith.constant 0 : i32
    %c0_i32_1 = arith.constant 0 : i32
    return %c0_i32, %c0_i32_0 : i32, i32
  }
  func.func @transform_1(%arg0: i32, %arg1: i32) -> i32 {
    %c0_i32 = arith.constant 0 : i32
    %c0_i32_0 = arith.constant 0 : i32
    return %c0_i32 : i32
  }
  func.func @transform_2(%arg0: i32, %arg1: i32) -> (i32, i32, i32, i32) {
    %c0_i32 = arith.constant 0 : i32
    %c0_i32_0 = arith.constant 0 : i32
    %c0_i32_1 = arith.constant 0 : i32
    return %arg0, %c0_i32, %arg1, %c0_i32_0 : i32, i32, i32, i32
  }
  func.func @transform_3(%arg0: i32, %arg1: i32) -> (i32, i32, i32, i32) {
    %c0_i32 = arith.constant 0 : i32
    %c0_i32_0 = arith.constant 0 : i32
    %c0_i32_1 = arith.constant 0 : i32
    return %arg0, %c0_i32, %arg1, %c0_i32_0 : i32, i32, i32, i32
  }
}

</mosaic_0001>

<bundles_post_ra>
// kernel: decoder_forward.3
= control target key start
LH: loop header
LB: loop body
LE: loop exit
PB: predicated region body
PF: predicated region fallthrough
CT: control target
= control target key end

     0   :  { %8 = vsyncpa [#allocation3], 0  ;;  %s833_s0 = inlined_call_operand.vmem [shape: f32[8,4], index: 0, kind: input, shape index: {}]   ;;  %s834_s1 = inlined_call_operand.vmem [shape: f32[8], index: 1, kind: input, shape index: {}]   ;;  %s835_s2 = inlined_call_operand.vmem [shape: f32[2,4,2,128], index: 2, kind: input, shape index: {}]   ;;  %s836_s3 = inlined_call_operand.vmem [shape: f32[2,8,2,128], index: 3, kind: output, shape index: {}]  }
   0x1   :  { %9 = vsyncpa [#allocation5], 0  ;;  %s703_s12 = smov 0   ;;  %s705_s13 = smov 0  }
   0x2   :  { %s707_s14 = smov 0  }
   0x3 LB: > { %s509_s15 = sadd.s32 4294967295, %s679_s14   ;;  %s27_s16 = sadd.s32 1, %s675_s13  ;;  %s679_s14 = sphi %s707_s14, %s15_s14   ;;  %s675_s13 = sphi %s705_s13, %s839_s13   ;;  %s671_s12 = sphi %s703_s12, %s838_s12  }
   0x4   : > { %p29_p0 = scmp.ge.s32.totalorder %s27_s16, 2  ;;  %p511_p1 = scmp.ge.s32.totalorder %s679_s14, 1 }
   0x5   : > { %p130_p2 = scmp.lt.s32.totalorder %s679_s14, 3  ;;  %p724_p4 = scmp.eq.s32.totalorder %s509_s15, 0 }
   0x6   : > { %s841_s16 = smov (%p29_p0, %s27_s16), 0  ;;  %s142_s20 = sshll.u32 %s833_s0, 4  ;;  %s143_s20 = int_to_ptr.vmem [resolvable:$true] %s142_s20 }
   0x7   : > { %p131_p3 = pnand %p511_p1, %p130_p2  ;;  %s152_s23 = sshll.u32 %s834_s1, 4  ;;  %s153_s23 = int_to_ptr.vmem [resolvable:$true] %s152_s23 }
   0x8   : > { %s681_s24 = smov [#allocation2]   ;;  %s682_s25 = smov [#allocation4]  }
   0x9   : > { %p582_p5 = pneg %p131_p3 }
   0xa   : > { %176 = sbr.rel (%p131_p3) target bundleno = 77 (0x4d), region = 32 }
   0xb   : > { %p583_p6 = pnand %p724_p4, %p582_p5 }
   0xd   : > { %585 = dma.vmem_to_smem (!%p583_p6), %s143_s20, 128, %s681_s24, [#allocation3]  }
   0xe   : > { %588 = dma.vmem_to_smem (!%p583_p6), %s153_s23, 16, %s682_s25, [#allocation5]  }
   0xf   : > { %662 = dma.done.wait (%p724_p4), [#allocation3], 128  }
  0x10   : > { %664 = vsyncadd (%p724_p4), [#allocation3], 4294967168 }
  0x11   : > { %666 = dma.done.wait (%p724_p4), [#allocation5], 16  }
  0x12   : > { %668 = vsyncadd (%p724_p4), [#allocation5], 4294967280 }
  0x13   : > { %188 = sfence }
  0x14   : > { %p213_p7 = scmp.lt.s32.totalorder %s671_s12, 1  ;;  %s236_s26 = sld [smem:[#allocation2]] }
  0x15   : > { %s525_s27 = sld [smem:[#allocation2 + $0x1]] }
  0x16   : > { %s843_s12 = smov (!%p213_p7, %s671_s12), 1  ;;  %s526_s28 = sld [smem:[#allocation2 + $0x2]] }
  0x17   : > { %s572_s29 = sshll.u32 %s843_s12, 3  ;;  %s527_s6 = sld [smem:[#allocation2 + $0x3]] }
  0x18   : > { %s220_s5 = scalar_lea.vmem %s835_s2, %s572_s29  ;;  %s251_s7 = sld [smem:[#allocation4]] }
  0x19   : > { %v752_v0 = vld [vmem:[%s220_s5] sm:$0x3]  ;;  %v754_v1 = vld [vmem:[%s220_s5 + $0x2] sm:$0x3]  ;;  %v756_v3 = vld [vmem:[%s220_s5 + $0x4] sm:$0x3] }
  0x1a   : > { %v237_v2 = vstv %s236_s26  ;;  %s528_s8 = sld [smem:[#allocation2 + $0x80]]  ;;  %v761_v10 = vld [vmem:[%s220_s5 + $0x6] sm:$0x3]  ;;  %s573_s19 = sshll.u32 %s843_s12, 4 }
  0x1b   : > { %v238_v4 = vmul.f32 %v237_v2, %v752_v0  ;;  %v240_v5 = vstv %s525_s27  ;;  %s529_s9 = sld [smem:[#allocation2 + $0x81]]  ;;  %s775_s12 = scalar_lea.vmem %s836_s3, %s573_s19 }
  0x1c   : > { %v241_v6 = vmul.f32 %v754_v1, %v240_v5  ;;  %v244_v7 = vstv %s526_s28  ;;  %s530_s10 = sld [smem:[#allocation2 + $0x82]] }
  0x1d   : > { %v245_v9 = vmul.f32 %v756_v3, %v244_v7  ;;  %s531_s11 = sld [smem:[#allocation2 + $0x83]]  ;;  %v248_v12 = vstv %s527_s6 }
  0x1e   : > { %v242_v8 = vadd.f32 %v241_v6, %v238_v4  ;;  %s763_s15 = sld [smem:[#allocation4 + $0x1]]  ;;  %v249_v13 = vmul.f32 %v761_v10, %v248_v12  ;;  %v252_v14 = vstv %s251_s7 }
  0x1f   : > { %s534_s17 = sld [smem:[#allocation2 + $0x100]] }
  0x20   : > { %v246_v11 = vadd.f32 %v245_v9, %v242_v8  ;;  %v257_v15 = vstv %s528_s8  ;;  %s535_s18 = sld [smem:[#allocation2 + $0x101]] }
  0x21   : > { %v258_v17 = vmul.f32 %v257_v15, %v752_v0  ;;  %v260_v18 = vstv %s529_s9  ;;  %s536_s20 = sld [smem:[#allocation2 + $0x102]] }
  0x22   : > { %v250_v16 = vadd.f32 %v249_v13, %v246_v11  ;;  %v261_v19 = vmul.f32 %v754_v1, %v260_v18  ;;  %v264_v20 = vstv %s530_s10  ;;  %s537_s21 = sld [smem:[#allocation2 + $0x103]] }
  0x23   : > { %v265_v22 = vmul.f32 %v756_v3, %v264_v20  ;;  %v268_v23 = vstv %s531_s11  ;;  %s770_s22 = sld [smem:[#allocation4 + $0x2]] }
  0x24   : > { %v253_v21 = vadd.f32 %v252_v14, %v250_v16  ;;  %v262_v24 = vadd.f32 %v261_v19, %v258_v17  ;;  %v269_v25 = vmul.f32 %v761_v10, %v268_v23  ;;  %s540_s25 = sld [smem:[#allocation2 + $0x180]]  ;;  %v272_v31 = vstv %s763_s15 }
  0x25   : > { %v278_v27 = vstv %s534_s17  ;;  %s541_s26 = sld [smem:[#allocation2 + $0x181]] }
  0x26   : > { %v254_v26 = vmax.f32 %v253_v21, 0.0  ;;  %v266_v28 = vadd.f32 %v265_v22, %v262_v24  ;;  %v279_v29 = vmul.f32 %v278_v27, %v752_v0  ;;  %v281_v30 = vstv %s535_s18  ;;  %s542_s27 = sld [smem:[#allocation2 + $0x182]] }
  0x27   : > { %v282_v32 = vmul.f32 %v754_v1, %v281_v30  ;;  %v285_v33 = vstv %s536_s20  ;;  %s543_s28 = sld [smem:[#allocation2 + $0x183]] }
  0x28   : > { %255 = vst [vmem:[%s775_s12] sm:$0x3] %v254_v26  ;;  %v270_v34 = vadd.f32 %v269_v25, %v266_v28  ;;  %v286_v35 = vmul.f32 %v756_v3, %v285_v33  ;;  %v289_v36 = vstv %s537_s21  ;;  %s783_s29 = sld [smem:[#allocation4 + $0x3]] }
  0x29   : > { %v283_v37 = vadd.f32 %v282_v32, %v279_v29  ;;  %v290_v38 = vmul.f32 %v761_v10, %v289_v36  ;;  %s546_s30 = sld [smem:[#allocation2 + $0x200]]  ;;  %v293_v45 = vstv %s770_s22 }
  0x2a   : > { %v273_v39 = vadd.f32 %v272_v31, %v270_v34  ;;  %v299_v40 = vstv %s540_s25  ;;  %s547_s4 = sld [smem:[#allocation2 + $0x201]] }
  0x2b   : > { %v287_v41 = vadd.f32 %v286_v35, %v283_v37  ;;  %v300_v42 = vmul.f32 %v299_v40, %v752_v0  ;;  %v302_v43 = vstv %s541_s26  ;;  %s548_s5 = sld [smem:[#allocation2 + $0x202]] }
  0x2c   : > { %v274_v44 = vmax.f32 %v273_v39, 0.0  ;;  %v303_v46 = vmul.f32 %v754_v1, %v302_v43  ;;  %v306_v47 = vstv %s542_s27  ;;  %s549_s6 = sld [smem:[#allocation2 + $0x203]] }
  0x2d   : > { %v291_v48 = vadd.f32 %v290_v38, %v287_v41  ;;  %v307_v49 = vmul.f32 %v756_v3, %v306_v47  ;;  %v310_v50 = vstv %s543_s28  ;;  %s790_s7 = sld [smem:[#allocation4 + $0x4]] }
  0x2e   : > { %533 = vst [vmem:[%s775_s12 + $0x2] sm:$0x3] %v274_v44  ;;  %v304_v51 = vadd.f32 %v303_v46, %v300_v42  ;;  %v311_v52 = vmul.f32 %v761_v10, %v310_v50  ;;  %s552_s8 = sld [smem:[#allocation2 + $0x280]]  ;;  %v314_v59 = vstv %s783_s29 }
  0x2f   : > { %v294_v53 = vadd.f32 %v293_v45, %v291_v48  ;;  %v320_v54 = vstv %s546_s30  ;;  %s553_s9 = sld [smem:[#allocation2 + $0x281]] }
  0x30   : > { %v308_v55 = vadd.f32 %v307_v49, %v304_v51  ;;  %v321_v56 = vmul.f32 %v320_v54, %v752_v0  ;;  %v323_v57 = vstv %s547_s4  ;;  %s554_s10 = sld [smem:[#allocation2 + $0x282]] }
  0x31   : > { %v295_v58 = vmax.f32 %v294_v53, 0.0  ;;  %v324_v60 = vmul.f32 %v754_v1, %v323_v57  ;;  %v327_v61 = vstv %s548_s5  ;;  %s555_s11 = sld [smem:[#allocation2 + $0x283]] }
  0x32   : > { %v312_v62 = vadd.f32 %v311_v52, %v308_v55  ;;  %v328_v63 = vmul.f32 %v756_v3, %v327_v61  ;;  %v331_v2 = vstv %s549_s6  ;;  %s798_s15 = sld [smem:[#allocation4 + $0x5]] }
  0x33   : > { %539 = vst [vmem:[%s775_s12 + $0x4] sm:$0x3] %v295_v58  ;;  %v325_v4 = vadd.f32 %v324_v60, %v321_v56  ;;  %v332_v5 = vmul.f32 %v761_v10, %v331_v2  ;;  %s558_s17 = sld [smem:[#allocation2 + $0x300]]  ;;  %v335_v13 = vstv %s790_s7 }
  0x34   : > { %v315_v6 = vadd.f32 %v314_v59, %v312_v62  ;;  %v341_v7 = vstv %s552_s8  ;;  %s559_s18 = sld [smem:[#allocation2 + $0x301]] }
  0x35   : > { %v329_v8 = vadd.f32 %v328_v63, %v325_v4  ;;  %v342_v9 = vmul.f32 %v341_v7, %v752_v0  ;;  %v344_v11 = vstv %s553_s9  ;;  %s560_s19 = sld [smem:[#allocation2 + $0x302]] }
  0x36   : > { %v316_v12 = vmax.f32 %v315_v6, 0.0  ;;  %v345_v14 = vmul.f32 %v754_v1, %v344_v11  ;;  %v348_v15 = vstv %s554_s10  ;;  %s561_s20 = sld [smem:[#allocation2 + $0x303]] }
  0x37   : > { %v333_v16 = vadd.f32 %v332_v5, %v329_v8  ;;  %v349_v17 = vmul.f32 %v756_v3, %v348_v15  ;;  %v352_v18 = vstv %s555_s11  ;;  %s806_s21 = sld [smem:[#allocation4 + $0x6]] }
  0x38   : > { %545 = vst [vmem:[%s775_s12 + $0x6] sm:$0x3] %v316_v12  ;;  %v346_v19 = vadd.f32 %v345_v14, %v342_v9  ;;  %v353_v20 = vmul.f32 %v761_v10, %v352_v18  ;;  %s564_s22 = sld [smem:[#allocation2 + $0x380]]  ;;  %v356_v27 = vstv %s798_s15 }
  0x39   : > { %v336_v21 = vadd.f32 %v335_v13, %v333_v16  ;;  %v362_v22 = vstv %s558_s17  ;;  %s565_s23 = sld [smem:[#allocation2 + $0x381]] }
  0x3a   : > { %v350_v23 = vadd.f32 %v349_v17, %v346_v19  ;;  %v363_v24 = vmul.f32 %v362_v22, %v752_v0  ;;  %v365_v25 = vstv %s559_s18  ;;  %s566_s24 = sld [smem:[#allocation2 + $0x382]] }
  0x3b   : > { %v337_v26 = vmax.f32 %v336_v21, 0.0  ;;  %v366_v28 = vmul.f32 %v754_v1, %v365_v25  ;;  %v369_v29 = vstv %s560_s19  ;;  %s567_s25 = sld [smem:[#allocation2 + $0x383]] }
  0x3c   : > { %v354_v30 = vadd.f32 %v353_v20, %v350_v23  ;;  %v370_v31 = vmul.f32 %v756_v3, %v369_v29  ;;  %v373_v32 = vstv %s561_s20  ;;  %s568_s26 = sld [smem:[#allocation4 + $0x7]] }
  0x3d   : > { %551 = vst [vmem:[%s775_s12 + $0x8] sm:$0x3] %v337_v26  ;;  %v367_v33 = vadd.f32 %v366_v28, %v363_v24  ;;  %v374_v34 = vmul.f32 %v761_v10, %v373_v32  ;;  %v377_v41 = vstv %s806_s21 }
  0x3e   : > { %v357_v35 = vadd.f32 %v356_v27, %v354_v30  ;;  %v383_v36 = vstv %s564_s22 }
  0x3f   : > { %v371_v37 = vadd.f32 %v370_v31, %v367_v33  ;;  %v384_v38 = vmul.f32 %v383_v36, %v752_v0  ;;  %v386_v39 = vstv %s565_s23 }
  0x40   : > { %v358_v40 = vmax.f32 %v357_v35, 0.0  ;;  %v387_v42 = vmul.f32 %v754_v1, %v386_v39  ;;  %v390_v43 = vstv %s566_s24 }
  0x41   : > { %v375_v44 = vadd.f32 %v374_v34, %v371_v37  ;;  %v391_v45 = vmul.f32 %v756_v3, %v390_v43  ;;  %v394_v46 = vstv %s567_s25 }
  0x42   : > { %557 = vst [vmem:[%s775_s12 + $0xa] sm:$0x3] %v358_v40  ;;  %v388_v47 = vadd.f32 %v387_v42, %v384_v38  ;;  %v395_v48 = vmul.f32 %v761_v10, %v394_v46  ;;  %v398_v0 = vstv %s568_s26 }
  0x43   : > { %v378_v49 = vadd.f32 %v377_v41, %v375_v44 }
  0x44   : > { %v392_v50 = vadd.f32 %v391_v45, %v388_v47 }
  0x45   : > { %v379_v51 = vmax.f32 %v378_v49, 0.0 }
  0x46   : > { %v396_v52 = vadd.f32 %v395_v48, %v392_v50 }
  0x47   : > { %563 = vst [vmem:[%s775_s12 + $0xc] sm:$0x3] %v379_v51 }
  0x48   : > { %v399_v53 = vadd.f32 %v398_v0, %v396_v52 }
  0x4a   : > { %v400_v54 = vmax.f32 %v399_v53, 0.0 }
  0x4c   : > { %569 = vst [vmem:[%s775_s12 + $0xe] sm:$0x3] %v400_v54 }
  0x4d PF: > { %s15_s14 = sadd.s32 1, %s679_s14   ;;  %s838_s12 = smov %s675_s13 }
  0x4e   : > { %p12_p8 = scmp.ge.s32.totalorder %s15_s14, 4   ;;  %s839_s13 = smov %s841_s16 }
  0x50   :  { %14 = sbr.rel (!%p12_p8) target bundleno = 3 (0x3), region = 81 }
  0x55   :  { %430 = vsyncpa [#allocation3], 1 }
  0x56   :  { %432 = vsyncpa [#allocation3 + $0x1], 1 }
  0x57   :  { %433 = vsyncpa [#allocation5], 1 }

// kernel: decoder_forward.2
= control target key start
LH: loop header
LB: loop body
LE: loop exit
PB: predicated region body
PF: predicated region fallthrough
CT: control target
= control target key end

     0   :  { %s449_s6 = smov 0   ;;  %s451_s7 = smov 0   ;;  %s536_s0 = inlined_call_operand.vmem [shape: f32[2,4,2,128], index: 0, kind: input, shape index: {}]   ;;  %s537_s1 = inlined_call_operand.vmem [shape: f32[2,14,128], index: 1, kind: output, shape index: {}]  }
   0x1   :  { %s453_s8 = smov 0  }
   0x2 LB: > { %s23_s9 = sadd.s32 1, %s432_s7  ;;  %p377_p0 = scmp.ge.s32.totalorder %s436_s8, 1  ;;  %s436_s8 = sphi %s453_s8, %s11_s8   ;;  %s432_s7 = sphi %s451_s7, %s539_s7   ;;  %s428_s6 = sphi %s449_s6, %s538_s6  }
   0x3   : > { %p25_p1 = scmp.ge.s32.totalorder %s23_s9, 2  ;;  %p104_p2 = scmp.lt.s32.totalorder %s436_s8, 3 }
   0x5   : > { %s541_s9 = smov (%p25_p1, %s23_s9), 0  ;;  %p105_p3 = pnand %p377_p0, %p104_p2 }
   0x6   : > { %p127_p4 = scmp.lt.s32.totalorder (!%p105_p3), %s428_s6, 1 }
   0x7   : > { %108 = sbr.rel (%p105_p3) target bundleno = 57 (0x39), region = 24 }
   0xc   : > { %s543_s6 = smov (!%p127_p4, %s428_s6), 1  ;;  %vm154_vm0 = vcmask 1041408   ;;  %v438_v0 = vmov 0.0  }
   0xd   : > { %s388_s10 = sshll.u32 %s543_s6, 4  ;;  %s387_s11 = sshll.u32 %s543_s6, 3 }
   0xe   : > { %s470_s14 = scalar_lea.vmem %s537_s1, %s388_s10  ;;  %s134_s17 = scalar_lea.vmem %s536_s0, %s387_s11 }
   0xf   : > { %144 = vst [vmem:[%s470_s14] sm:$0xff] %v438_v0  ;;  %v146_v1 = vld [vmem:[%s134_s17] sm:$0x3]  ;;  %v382_v2 = vld [vmem:[%s134_s17 + $0x2] sm:$0x3]  ;;  %v383_v3 = vld [vmem:[%s134_s17 + $0x4] sm:$0x3] }
  0x10   : > { %145 = vst [vmem:[%s470_s14 + $0x8] sm:$0x3f] %v438_v0  ;;  %v155_v4 = vsel %vm154_vm0, %v146_v1, 0.0  ;;  %v165_v5 = vsel %vm154_vm0, %v382_v2, 0.0  ;;  %v175_v6 = vsel %vm154_vm0, %v383_v3, 0.0  ;;  %v195_v7 = vmul.f32 %v146_v1, %v146_v1 }
  0x11   : > { %v156_v8 = vrot.slane %v155_v4, 4  ;;  %v166_v9 = vrot.slane %v165_v5, 4  ;;  %v176_v10 = vrot.slane %v175_v6, 4  ;;  %v480_v11 = vld [vmem:[%s134_s17 + $0x6] sm:$0x3]  ;;  %v206_v12 = vmul.f32 %v382_v2, %v146_v1 }
  0x12   : > { %v185_v13 = vsel %vm154_vm0, %v480_v11, 0.0  ;;  %v196_v14 = vsel %vm154_vm0, %v195_v7, 0.0  ;;  %v217_v15 = vmul.f32 %v383_v3, %v146_v1  ;;  %v228_v16 = vmul.f32 %v480_v11, %v146_v1 }
  0x13   : > { %v157_v17 = vadd.f32 %v156_v8, %v155_v4  ;;  %v167_v18 = vadd.f32 %v166_v9, %v165_v5  ;;  %v177_v19 = vadd.f32 %v176_v10, %v175_v6  ;;  %v186_v20 = vrot.slane %v185_v13, 4 }
  0x14   : > { %v197_v21 = vrot.slane %v196_v14, 4  ;;  %v207_v22 = vsel %vm154_vm0, %v206_v12, 0.0  ;;  %v218_v23 = vsel %vm154_vm0, %v217_v15, 0.0  ;;  %v229_v24 = vsel %vm154_vm0, %v228_v16, 0.0 }
  0x15   : > { %v158_v25 = vrot.slane %v157_v17, 2  ;;  %v168_v26 = vrot.slane %v167_v18, 2  ;;  %v178_v27 = vrot.slane %v177_v19, 2  ;;  %v187_v28 = vadd.f32 %v186_v20, %v185_v13 }
  0x16   : > { %v198_v29 = vadd.f32 %v197_v21, %v196_v14  ;;  %v239_v30 = vmul.f32 %v382_v2, %v382_v2  ;;  %v250_v31 = vmul.f32 %v383_v3, %v382_v2  ;;  %v261_v32 = vmul.f32 %v480_v11, %v382_v2  ;;  %v153_v41 = vld [vmem:[%s470_s14] sm:$0x1]  ;;  %v164_v46 = vld [vmem:[%s470_s14 + $0x1] sm:$0x1]  ;;  %v174_v47 = vld [vmem:[%s470_s14 + $0x2] sm:$0x1] }
  0x17   : > { %v159_v33 = vadd.f32 %v158_v25, %v157_v17  ;;  %v169_v34 = vadd.f32 %v168_v26, %v167_v18  ;;  %v179_v35 = vadd.f32 %v178_v27, %v177_v19  ;;  %v188_v36 = vrot.slane %v187_v28, 2  ;;  %v184_v56 = vld [vmem:[%s470_s14 + $0x3] sm:$0x1]  ;;  %v194_v1 = vld [vmem:[%s470_s14 + $0x4] sm:$0x1] }
  0x18   : > { %v199_v37 = vrot.slane %v198_v29, 2  ;;  %v208_v38 = vrot.slane %v207_v22, 4  ;;  %v272_v39 = vmul.f32 %v383_v3, %v383_v3  ;;  %v283_v40 = vmul.f32 %v480_v11, %v383_v3  ;;  %v205_v12 = vld [vmem:[%s470_s14 + $0x5] sm:$0x1]  ;;  %v216_v16 = vld [vmem:[%s470_s14 + $0x6] sm:$0x1] }
  0x19   : > { %v160_v42 = vrot.slane %v159_v33, 1  ;;  %v170_v43 = vrot.slane %v169_v34, 1  ;;  %v180_v44 = vrot.slane %v179_v35, 1  ;;  %v189_v45 = vadd.f32 %v188_v36, %v187_v28  ;;  %v227_v25 = vld [vmem:[%s470_s14 + $0x7] sm:$0x1] }
  0x1a   : > { %v200_v48 = vadd.f32 %v199_v37, %v198_v29  ;;  %v209_v49 = vadd.f32 %v208_v38, %v207_v22  ;;  %v219_v50 = vrot.slane %v218_v23, 4  ;;  %v230_v51 = vrot.slane %v229_v24, 4 }
  0x1b   : > { %v161_v52 = vadd.f32 %v160_v42, %v159_v33  ;;  %v171_v53 = vadd.f32 %v170_v43, %v169_v34  ;;  %v181_v54 = vadd.f32 %v180_v44, %v179_v35  ;;  %v190_v55 = vrot.slane %v189_v45, 1 }
  0x1c   : > { %v201_v57 = vrot.slane %v200_v48, 1  ;;  %v210_v58 = vrot.slane %v209_v49, 2  ;;  %v220_v59 = vadd.f32 %v219_v50, %v218_v23  ;;  %v231_v60 = vadd.f32 %v230_v51, %v229_v24 }
  0x1d   : > { %v162_v61 = vadd.f32 %v161_v52, %v153_v41  ;;  %v172_v62 = vadd.f32 %v171_v53, %v164_v46  ;;  %v182_v63 = vadd.f32 %v181_v54, %v174_v47  ;;  %v191_v0 = vadd.f32 %v190_v55, %v189_v45  ;;  %v238_v46 = vld [vmem:[%s470_s14 + $0x8] sm:$0x1]  ;;  %v249_v53 = vld [vmem:[%s470_s14 + $0x9] sm:$0x1]  ;;  %v260_v54 = vld [vmem:[%s470_s14 + $0xa] sm:$0x1] }
  0x1e   : > { %v202_v2 = vadd.f32 %v201_v57, %v200_v48  ;;  %v211_v3 = vadd.f32 %v210_v58, %v209_v49  ;;  %v221_v4 = vrot.slane %v220_v59, 2  ;;  %v232_v5 = vrot.slane %v231_v60, 2 }
  0x1f   : > { %163 = vst [vmem:[%s470_s14] sm:$0x1] %v162_v61  ;;  %v192_v6 = vadd.f32 %v191_v0, %v184_v56  ;;  %v240_v7 = vsel %vm154_vm0, %v239_v30, 0.0  ;;  %v251_v8 = vsel %vm154_vm0, %v250_v31, 0.0  ;;  %v262_v9 = vsel %vm154_vm0, %v261_v32, 0.0 }
  0x20   : > { %173 = vst [vmem:[%s470_s14 + $0x1] sm:$0x1] %v172_v62  ;;  %v203_v10 = vadd.f32 %v202_v2, %v194_v1  ;;  %v212_v13 = vrot.slane %v211_v3, 1  ;;  %v222_v14 = vadd.f32 %v221_v4, %v220_v59  ;;  %v233_v15 = vadd.f32 %v232_v5, %v231_v60  ;;  %v271_v59 = vld [vmem:[%s470_s14 + $0xb] sm:$0x1] }
  0x21   : > { %183 = vst [vmem:[%s470_s14 + $0x2] sm:$0x1] %v182_v63  ;;  %v241_v17 = vrot.slane %v240_v7, 4  ;;  %v252_v18 = vrot.slane %v251_v8, 4  ;;  %v263_v19 = vrot.slane %v262_v9, 4  ;;  %v273_v20 = vsel %vm154_vm0, %v272_v39, 0.0 }
  0x22   : > { %193 = vst [vmem:[%s470_s14 + $0x3] sm:$0x1] %v192_v6  ;;  %v213_v21 = vadd.f32 %v212_v13, %v211_v3  ;;  %v223_v22 = vrot.slane %v222_v14, 1  ;;  %v234_v23 = vrot.slane %v233_v15, 1  ;;  %v274_v24 = vrot.slane %v273_v20, 4 }
  0x23   : > { %204 = vst [vmem:[%s470_s14 + $0x4] sm:$0x1] %v203_v10  ;;  %v242_v26 = vadd.f32 %v241_v17, %v240_v7  ;;  %v253_v27 = vadd.f32 %v252_v18, %v251_v8  ;;  %v264_v28 = vadd.f32 %v263_v19, %v262_v9  ;;  %v284_v29 = vsel %vm154_vm0, %v283_v40, 0.0  ;;  %v282_v4 = vld [vmem:[%s470_s14 + $0xc] sm:$0x1] }
  0x24   : > { %v214_v30 = vadd.f32 %v213_v21, %v205_v12  ;;  %v224_v31 = vadd.f32 %v223_v22, %v222_v14  ;;  %v235_v32 = vadd.f32 %v234_v23, %v233_v15  ;;  %v275_v33 = vadd.f32 %v274_v24, %v273_v20  ;;  %v293_v10 = vld [vmem:[%s470_s14 + $0xd] sm:$0x1] }
  0x25   : > { %v243_v34 = vrot.slane %v242_v26, 2  ;;  %v254_v35 = vrot.slane %v253_v27, 2  ;;  %v265_v36 = vrot.slane %v264_v28, 2  ;;  %v285_v37 = vrot.slane %v284_v29, 4 }
  0x26   : > { %215 = vst [vmem:[%s470_s14 + $0x5] sm:$0x1] %v214_v30  ;;  %v225_v38 = vadd.f32 %v224_v31, %v216_v16  ;;  %v236_v39 = vadd.f32 %v235_v32, %v227_v25  ;;  %v276_v41 = vrot.slane %v275_v33, 2  ;;  %v294_v40 = vmul.f32 %v480_v11, %v480_v11 }
  0x27   : > { %v244_v42 = vadd.f32 %v243_v34, %v242_v26  ;;  %v255_v43 = vadd.f32 %v254_v35, %v253_v27  ;;  %v266_v44 = vadd.f32 %v265_v36, %v264_v28  ;;  %v286_v45 = vadd.f32 %v285_v37, %v284_v29 }
  0x28   : > { %226 = vst [vmem:[%s470_s14 + $0x6] sm:$0x1] %v225_v38  ;;  %v277_v47 = vadd.f32 %v276_v41, %v275_v33  ;;  %v295_v48 = vsel %vm154_vm0, %v294_v40, 0.0 }
  0x29   : > { %237 = vst [vmem:[%s470_s14 + $0x7] sm:$0x1] %v236_v39  ;;  %v245_v49 = vrot.slane %v244_v42, 1  ;;  %v256_v50 = vrot.slane %v255_v43, 1  ;;  %v267_v51 = vrot.slane %v266_v44, 1  ;;  %v287_v52 = vrot.slane %v286_v45, 2 }
  0x2a   : > { %v278_v55 = vrot.slane %v277_v47, 1  ;;  %v296_v11 = vrot.slane %v295_v48, 4 }
  0x2b   : > { %v246_v56 = vadd.f32 %v245_v49, %v244_v42  ;;  %v257_v57 = vadd.f32 %v256_v50, %v255_v43  ;;  %v268_v58 = vadd.f32 %v267_v51, %v266_v44  ;;  %v288_v60 = vadd.f32 %v287_v52, %v286_v45 }
  0x2c   : > { %v279_v61 = vadd.f32 %v278_v55, %v277_v47  ;;  %v297_v62 = vadd.f32 %v296_v11, %v295_v48 }
  0x2d   : > { %v247_v63 = vadd.f32 %v246_v56, %v238_v46  ;;  %v258_v0 = vadd.f32 %v257_v57, %v249_v53  ;;  %v269_v1 = vadd.f32 %v268_v58, %v260_v54  ;;  %v289_v2 = vrot.slane %v288_v60, 1 }
  0x2e   : > { %v280_v3 = vadd.f32 %v279_v61, %v271_v59  ;;  %v298_v5 = vrot.slane %v297_v62, 2 }
  0x2f   : > { %248 = vst [vmem:[%s470_s14 + $0x8] sm:$0x1] %v247_v63  ;;  %v290_v6 = vadd.f32 %v289_v2, %v288_v60 }
  0x30   : > { %259 = vst [vmem:[%s470_s14 + $0x9] sm:$0x1] %v258_v0  ;;  %v299_v7 = vadd.f32 %v298_v5, %v297_v62 }
  0x31   : > { %270 = vst [vmem:[%s470_s14 + $0xa] sm:$0x1] %v269_v1  ;;  %v291_v8 = vadd.f32 %v290_v6, %v282_v4 }
  0x32   : > { %281 = vst [vmem:[%s470_s14 + $0xb] sm:$0x1] %v280_v3  ;;  %v300_v9 = vrot.slane %v299_v7, 1 }
  0x33   : > { %292 = vst [vmem:[%s470_s14 + $0xc] sm:$0x1] %v291_v8 }
  0x34   : > { %v301_v12 = vadd.f32 %v300_v9, %v299_v7 }
  0x36   : > { %v302_v13 = vadd.f32 %v301_v12, %v293_v10 }
  0x38   : > { %303 = vst [vmem:[%s470_s14 + $0xd] sm:$0x1] %v302_v13 }
  0x39 PF: > { %s11_s8 = sadd.s32 1, %s436_s8   ;;  %s538_s6 = smov %s432_s7 }
  0x3a   : > { %p8_p5 = scmp.ge.s32.totalorder %s11_s8, 4   ;;  %s539_s7 = smov %s541_s9 }
  0x3c   :  { %10 = sbr.rel (!%p8_p5) target bundleno = 2 (0x2), region = 61 }

</bundles_post_ra>
